<compile_context>
chip_gen: v5e
topology: v5e:2x2
jax: 0.10.0
libtpu: 0.0.40
codegen_flags: <defaults>
</compile_context>

<pallas_src>
import functools

import jax
import jax.numpy as jnp
from jax import lax
from jax.experimental import pallas as pl
from jax.experimental.pallas import tpu as pltpu

LANES = 128
SUBLANES = 8
TARGET_BLOCK_BYTES = 2 << 20      # per-input VMEM block (Pallas double-buffers it)
MIN_PALLAS_BYTES = 2 << 20        # below this per input -> plain-JAX fast path
MAX_RAGGED_LANE_ELEMS = 16384     # cap on the trailing-dims product used as lanes
NUM_SPLITS = 2                    # partial-sum splits -> the 2 TensorCores on v7x
VMEM_LIMIT_FLOOR = 32 << 20       # explicit scoped-VMEM cap (>= v5e's 16 MiB default)


def _round_up(a, b):
    return (a + b - 1) // b * b


def _sse_kernel(x_ref, y_ref, o_ref, acc_ref, *, row_tile, valid_rows, nb, inner,
                needs_mask):
    """Accumulate sum((x - y)^2) for this split; emit the (8, C) partial at the end."""
    c = pl.program_id(0)      # partial-sum split ("parallel")
    i = pl.program_id(1)      # reduction step within the split ("arbitrary")
    s = c * inner + i         # logical row-block index (DMA index is clamped to nb-1)

    @pl.when(i == 0)
    def _():
        acc_ref[...] = jnp.zeros_like(acc_ref)

    # Cast inside the kernel so HBM traffic stays at the input dtype's footprint.
    d = x_ref[...].astype(jnp.float32) - y_ref[...].astype(jnp.float32)
    sq = d * d
    cols = sq.shape[1]

    def accumulate(v):
        # (8, C)-shaped VPU-only accumulation.  The reshape follows the native
        # (8, 128) tiling so it lowers to vreg-group adds (no XLU reduce, no
        # VMEM re-layout copy); the single cross-lane reduce happens once, in
        # the wrapper, on the tiny (splits*8, C) output.
        acc_ref[...] += v.reshape(row_tile // SUBLANES, SUBLANES, cols).sum(axis=0)

    if needs_mask:
        # Only the last (partial or clamped-overhang) step of each split pays for
        # the iota/compare/select; full interior blocks take the cheap path.
        @pl.when(s < nb - 1)
        def _():
            accumulate(sq)

        @pl.when(s >= nb - 1)
        def _():
            row_idx = s * row_tile + lax.broadcasted_iota(jnp.int32, sq.shape, 0)
            accumulate(jnp.where(row_idx < valid_rows, sq, 0.0))
    else:
        accumulate(sq)

    @pl.when(i == pl.num_programs(1) - 1)
    def _():
        o_ref[...] = acc_ref[...]


def _l2_loss_jax(x, y, n_elems):
    return jnp.sum((x.astype(jnp.float32) - y.astype(jnp.float32)) ** 2) / n_elems


def l2_loss_pallas(x, y, *, target_block_bytes=TARGET_BLOCK_BYTES,
                   min_pallas_bytes=MIN_PALLAS_BYTES,
                   max_ragged_lane_elems=MAX_RAGGED_LANE_ELEMS):
    assert x.shape == y.shape, "x and y must have identical shapes"
    assert x.ndim == 5, "L2Loss expects 5-D tensors (N, C, D, H, W)"

    n_elems = 1
    for s in y.shape:
        n_elems *= s
    itemsize = jnp.dtype(x.dtype).itemsize
    in_bytes = n_elems * itemsize

    # Small-input fast path: a pure-XLA reduction beats the fixed pallas_call
    # launch + single-step grid overhead below a couple of MiB.
    if n_elems == 0 or in_bytes < min_pallas_bytes:
        return _l2_loss_jax(x, y, n_elems)

    # ---- Choose a copy-free (rows, cols) 2-D view of the contiguous buffer. ----
    if n_elems % LANES == 0:
        cols = LANES                                # lane-perfect view
    else:
        # Ragged: use a trailing-dims product as the lane axis so the reshape is
        # a free view (no host-side slice / pad copy -> HBM traffic stays 2N).
        cols = x.shape[-1]
        for dim in reversed(x.shape[:-1]):
            if cols * dim > max_ragged_lane_elems:
                break
            cols *= dim

    rows = n_elems // cols
    cols_pad = _round_up(cols, LANES)

    # Dtype-aware sublane alignment: 8 rows f32, 16 bf16, 32 int8/fp8.
    row_align = SUBLANES * max(1, 4 // itemsize)

    # Pathological ragged trailing dim (huge and not 128-aligned): even a minimum
    # block would not fit comfortably in VMEM.
    if 10 * row_align * cols_pad * max(itemsize, 4) > (48 << 20):
        # TODO(synk): extremely wide non-aligned trailing dims fall back to XLA.
        return _l2_loss_jax(x, y, n_elems)

    x2 = x.reshape(rows, cols)     # free view of the contiguous buffer
    y2 = y.reshape(rows, cols)

    # Largest aligned row tile within the per-block byte budget.
    row_tile = max(row_align,
                   (target_block_bytes // (cols_pad * itemsize)) // row_align * row_align)
    row_tile = min(row_tile, _round_up(rows, row_align))

    nb = (rows + row_tile - 1) // row_tile            # logical row blocks
    splits = NUM_SPLITS if nb >= NUM_SPLITS else 1    # per-core partials (v7x)
    inner = (nb + splits - 1) // splits               # reduction steps per split
    needs_mask = (splits * inner * row_tile) != rows

    def in_map(c, i):
        # Clamp so overhanging steps re-read the last valid block (in-bounds DMA);
        # their contribution is masked to zero inside the kernel.
        return (jnp.minimum(c * inner + i, nb - 1), 0)

    kernel = functools.partial(
        _sse_kernel, row_tile=row_tile, valid_rows=rows, nb=nb, inner=inner,
        needs_mask=needs_mask)

    # Explicit VMEM budget: 2 inputs x 2 pipeline buffers + f32 intermediates
    # + accumulator + double-buffered output, plus slack for Mosaic scratch.
    block_in_bytes = row_tile * cols_pad * itemsize
    block_f32_bytes = row_tile * cols_pad * 4
    vmem_need = (4 * block_in_bytes + 3 * block_f32_bytes
                 + 3 * SUBLANES * cols_pad * 4 + (4 << 20))
    vmem_limit = int(min(max(VMEM_LIMIT_FLOOR, vmem_need), 56 << 20))

    partials = pl.pallas_call(
        kernel,
        out_shape=jax.ShapeDtypeStruct((splits * SUBLANES, cols), jnp.float32),
        grid_spec=pltpu.PrefetchScalarGridSpec(
            num_scalar_prefetch=0,
            grid=(splits, inner),
            in_specs=[
                # NOTE: pipeline_mode=pl.Buffered(3) is a possible v7x tweak; left
                # at the default 2-deep buffering to preserve VMEM headroom.
                pl.BlockSpec((row_tile, cols), in_map),
                pl.BlockSpec((row_tile, cols), in_map),
            ],
            out_specs=pl.BlockSpec((SUBLANES, cols), lambda c, i: (c, 0)),
            scratch_shapes=[pltpu.VMEM((SUBLANES, cols), jnp.float32)],
        ),
        compiler_params=pltpu.CompilerParams(
            # TODO(synk): verify on v7x (xprof per-core timeline) that the leading
            # axis shards across both TensorCores; if not, switch it to
            # pltpu.CORE_PARALLEL or wrap in pl.core_map.
            dimension_semantics=("parallel", "arbitrary"),
            vmem_limit_bytes=vmem_limit,
        ),
    )(x2, y2)

    # Single deferred cross-lane reduce on the tiny (splits*8, cols) partials.
    return jnp.sum(partials) / n_elems


def _ref_loss(x, y):
    n = 1
    for s in y.shape:
        n *= s
    return jnp.sum((x.astype(jnp.float32) - y.astype(jnp.float32)) ** 2) / n


if __name__ == "__main__":
    key = jax.random.PRNGKey(0)

    def check(out, x, y, tag):
        ref = _ref_loss(x, y)
        assert jnp.allclose(out, ref, rtol=1e-4, atol=1e-5), (tag, out, ref)

    # 1) Lane-aligned 5-D shape (N, C, D, H, W): single-block Pallas path (forced).
    k1, k2, key = jax.random.split(key, 3)
    shape_a = (2, 4, 16, 16, 32)        # 65536 elements -> 512 rows of 128 lanes
    xa = jax.random.normal(k1, shape_a, dtype=jnp.float32)
    ya = jax.random.normal(k2, shape_a, dtype=jnp.float32)
    out = jax.block_until_ready(l2_loss_pallas(xa, ya, min_pallas_bytes=0))
    check(out, xa, ya, "aligned-single-block")

    # 2) Same data, small block override -> multi-step grid + 2-way split, no mask.
    out = jax.block_until_ready(
        l2_loss_pallas(xa, ya, min_pallas_bytes=0,
                       target_block_bytes=64 * LANES * 4))
    check(out, xa, ya, "aligned-multi-block")

    # 3) Ragged shape (numel % 128 != 0): copy-free trailing-dims view + in-kernel mask.
    k3, k4, key = jax.random.split(key, 3)
    shape_b = (2, 3, 5, 7, 32)          # 6720 elements -> (1, 6720) view, masked rows
    xb = jax.random.normal(k3, shape_b, dtype=jnp.float32)
    yb = jax.random.normal(k4, shape_b, dtype=jnp.float32)
    out = jax.block_until_ready(l2_loss_pallas(xb, yb, min_pallas_bytes=0))
    check(out, xb, yb, "ragged-single-block")

    # 4) Ragged shape with multi-block grid: gated mask fires only on the last step.
    k5, k6, key = jax.random.split(key, 3)
    shape_c = (13, 3, 5, 7, 32)         # (13, 3360) view -> 2 blocks of 8 rows, masked tail
    xc = jax.random.normal(k5, shape_c, dtype=jnp.float32)
    yc = jax.random.normal(k6, shape_c, dtype=jnp.float32)
    out = jax.block_until_ready(
        l2_loss_pallas(xc, yc, min_pallas_bytes=0,
                       target_block_bytes=8 * _round_up(3360, LANES) * 4))
    check(out, xc, yc, "ragged-multi-block")

    # 5) Default configuration (2 MiB blocks, explicit vmem limit, 2-way split).
    k7, k8, key = jax.random.split(key, 3)
    shape_d = (4, 8, 16, 32, 64)        # 1,048,576 elements = 4 MiB f32 per input
    xd = jax.random.normal(k7, shape_d, dtype=jnp.float32)
    yd = jax.random.normal(k8, shape_d, dtype=jnp.float32)
    out = jax.block_until_ready(l2_loss_pallas(xd, yd))
    check(out, xd, yd, "default-config")

    # 6) Small-input fast path (plain JAX) with default thresholds.
    out = jax.block_until_ready(l2_loss_pallas(xa, ya))
    check(out, xa, ya, "small-fast-path")

    print("KERNEL_OK")
</pallas_src>

<mosaic_0001>
module attributes {stable_mosaic.version = 11 : i64} {
  func.func @_sse_kernel(%arg0: i32, %arg1: i32, %arg2: memref<512x128xf32, #tpu.memory_space<vmem>>, %arg3: memref<512x128xf32, #tpu.memory_space<vmem>>, %arg4: memref<8x128xf32, #tpu.memory_space<vmem>>, %arg5: memref<8x128xf32, #tpu.memory_space<vmem>>) attributes {dimension_semantics = [#tpu.dimension_semantics<parallel>, #tpu.dimension_semantics<arbitrary>], iteration_bounds = array<i64: 1, 1>, scalar_prefetch = 0 : i64, scratch_operands = 1 : i64, tpu.core_type = #tpu.core_type<tc>, window_params = [{transform_indices = @transform_0, window_bounds = array<i64: 512, 128>}, {transform_indices = @transform_1, window_bounds = array<i64: 512, 128>}, {transform_indices = @transform_2, window_bounds = array<i64: 8, 128>}]} {
    %c0_i32 = arith.constant 0 : i32
    %0 = arith.cmpi eq, %arg1, %c0_i32 : i32
    %1 = arith.extui %0 : i1 to i32
    %c0_i32_0 = arith.constant 0 : i32
    %2 = arith.cmpi ne, %1, %c0_i32_0 : i32
    scf.if %2 {
      %cst_10 = arith.constant 0.000000e+00 : f32
      %15 = vector.broadcast %cst_10 : f32 to vector<8x128xf32>
      %c0_11 = arith.constant 0 : index
      %c0_12 = arith.constant 0 : index
      %16 = vector.load %arg5[%c0_11, %c0_12] : memref<8x128xf32, #tpu.memory_space<vmem>>, vector<8x128xf32>
      tpu.vector_store %arg5[%c0_11, %c0_12], %15 {strides = array<i32>} : memref<8x128xf32, #tpu.memory_space<vmem>>, vector<8x128xf32>,
    } else {
    }
    %c0 = arith.constant 0 : index
    %c0_1 = arith.constant 0 : index
    %3 = vector.load %arg2[%c0, %c0_1] : memref<512x128xf32, #tpu.memory_space<vmem>>, vector<512x128xf32>
    %c0_2 = arith.constant 0 : index
    %c0_3 = arith.constant 0 : index
    %4 = vector.load %arg3[%c0_2, %c0_3] : memref<512x128xf32, #tpu.memory_space<vmem>>, vector<512x128xf32>
    %5 = arith.subf %3, %4 : vector<512x128xf32>
    %6 = arith.mulf %5, %5 : vector<512x128xf32>
    %c0_4 = arith.constant 0 : index
    %c0_5 = arith.constant 0 : index
    %7 = vector.load %arg5[%c0_4, %c0_5] : memref<8x128xf32, #tpu.memory_space<vmem>>, vector<8x128xf32>
    %8 = vector.shape_cast %6 : vector<512x128xf32> to vector<64x8x128xf32>
    %cst = arith.constant dense<0.000000e+00> : vector<8x128xf32>
    %9 = vector.multi_reduction <add>, %8, %cst [0] : vector<64x8x128xf32> to vector<8x128xf32>
    %10 = arith.addf %7, %9 : vector<8x128xf32>
    %c0_6 = arith.constant 0 : index
    %c0_7 = arith.constant 0 : index
    %11 = vector.load %arg5[%c0_6, %c0_7] : memref<8x128xf32, #tpu.memory_space<vmem>>, vector<8x128xf32>
    tpu.vector_store %arg5[%c0_6, %c0_7], %10 {strides = array<i32>} : memref<8x128xf32, #tpu.memory_space<vmem>>, vector<8x128xf32>,
    %c0_i32_8 = arith.constant 0 : i32
    %12 = arith.cmpi eq, %arg1, %c0_i32_8 : i32
    %13 = arith.extui %12 : i1 to i32
    %c0_i32_9 = arith.constant 0 : i32
    %14 = arith.cmpi ne, %13, %c0_i32_9 : i32
    scf.if %14 {
      %c0_10 = arith.constant 0 : index
      %c0_11 = arith.constant 0 : index
      %15 = vector.load %arg5[%c0_10, %c0_11] : memref<8x128xf32, #tpu.memory_space<vmem>>, vector<8x128xf32>
      %c0_12 = arith.constant 0 : index
      %c0_13 = arith.constant 0 : index
      %16 = vector.load %arg4[%c0_12, %c0_13] : memref<8x128xf32, #tpu.memory_space<vmem>>, vector<8x128xf32>
      tpu.vector_store %arg4[%c0_12, %c0_13], %15 {strides = array<i32>} : memref<8x128xf32, #tpu.memory_space<vmem>>, vector<8x128xf32>,
    } else {
    }
    return
  }
  func.func @transform_0(%arg0: i32, %arg1: i32) -> (i32, i32) {
    %c1_i32 = arith.constant 1 : i32
    %0 = arith.muli %arg0, %c1_i32 : i32
    %1 = arith.addi %0, %arg1 : i32
    %c0_i32 = arith.constant 0 : i32
    %2 = arith.minsi %1, %c0_i32 : i32
    %c0_i32_0 = arith.constant 0 : i32
    %c0_i32_1 = arith.constant 0 : i32
    return %2, %c0_i32_0 : i32, i32
  }
  func.func @transform_1(%arg0: i32, %arg1: i32) -> (i32, i32) {
    %c1_i32 = arith.constant 1 : i32
    %0 = arith.muli %arg0, %c1_i32 : i32
    %1 = arith.addi %0, %arg1 : i32
    %c0_i32 = arith.constant 0 : i32
    %2 = arith.minsi %1, %c0_i32 : i32
    %c0_i32_0 = arith.constant 0 : i32
    %c0_i32_1 = arith.constant 0 : i32
    return %2, %c0_i32_0 : i32, i32
  }
  func.func @transform_2(%arg0: i32, %arg1: i32) -> (i32, i32) {
    %c0_i32 = arith.constant 0 : i32
    %c0_i32_0 = arith.constant 0 : i32
    return %arg0, %c0_i32 : i32, i32
  }
}

</mosaic_0001>

<bundles_post_ra>
// kernel: tpu_custom_call.1
= control target key start
LH: loop header
LB: loop body
LE: loop exit
PB: predicated region body
PF: predicated region fallthrough
CT: control target
= control target key end

     0   :  { %7 = vsyncpa [#allocation4], 0  ;;  %s530_s0 = inlined_call_operand.hbm [shape: f32[512,128], index: 0, kind: input, shape index: {}]   ;;  %s531_s1 = inlined_call_operand.hbm [shape: f32[512,128], index: 1, kind: input, shape index: {}]   ;;  %s532_s2 = inlined_call_operand.hbm [shape: f32[8,128], index: 2, kind: output, shape index: {}]  }
   0x1   :  { %8 = vsyncpa [#allocation7], 0 }
   0x2   :  { %9 = vsyncpa [#allocation5], 0  ;;  %s20_s11 = sshll.u32 %s530_s0, 4  ;;  %s501_s12 = smov [#allocation3]   ;;  %s21_s11 = int_to_ptr.hbm [resolvable:$true] %s20_s11 }
   0x3   :  { %s22_s13 = sshll.u32 %s501_s12, 4  ;;  %s39_s16 = sshll.u32 %s531_s1, 4  ;;  %s23_s13 = int_to_ptr.vmem [resolvable:$true] %s22_s13  ;;  %s40_s16 = int_to_ptr.hbm [resolvable:$true] %s39_s16 }
   0x4   :  { %s502_s17 = smov 128   ;;  %s503_s18 = smov 8  }
   0x5   :  { %28 = dma.hbm_to_vmem [thread:$0]  %s21_s11, 8192, %s23_s13, [#allocation4], %s502_s17, %s502_s17, %s503_s18  }
   0x6   :  { %s504_s19 = smov [#allocation6]  }
   0x7   :  { %s41_s20 = sshll.u32 %s504_s19, 4  ;;  %s42_s20 = int_to_ptr.vmem [resolvable:$true] %s41_s20 }
   0x8   :  { %47 = dma.hbm_to_vmem [thread:$0]  %s40_s16, 8192, %s42_s20, [#allocation7], %s502_s17, %s502_s17, %s503_s18  }
   0x9   :  { %495 = dma.done.wait [#allocation4], 8192  }
   0xa   :  { %496 = vsyncadd [#allocation4], 4294959104 }
   0xb   :  { %497 = dma.done.wait [#allocation7], 8192  }
   0xc   :  { %498 = vsyncadd [#allocation7], 4294959104  ;;  %v69_v0 = vld [vmem:[#allocation3] sm:$0xff]  ;;  %v70_v1 = vld [vmem:[#allocation3 + $0x8] sm:$0xff]  ;;  %s505_s0 = smov [#allocation8]   ;;  %s403_s23 = sshll.u32 %s532_s2, 4  ;;  %s404_s23 = int_to_ptr.hbm [resolvable:$true] %s403_s23 }
   0xd   :  { %v133_v2 = vld [vmem:[#allocation6] sm:$0xff]  ;;  %v134_v3 = vld [vmem:[#allocation6 + $0x8] sm:$0xff]  ;;  %v71_v4 = vld [vmem:[#allocation3 + $0x10] sm:$0xff]  ;;  %s401_s1 = sshll.u32 %s505_s0, 4  ;;  %s402_s1 = int_to_ptr.vmem [resolvable:$true] %s401_s1 }
   0xe   :  { %v135_v5 = vld [vmem:[#allocation6 + $0x10] sm:$0xff]  ;;  %v197_v6 = vsub.f32 %v69_v0, %v133_v2  ;;  %v198_v7 = vsub.f32 %v70_v1, %v134_v3  ;;  %v72_v8 = vld [vmem:[#allocation3 + $0x18] sm:$0xff]  ;;  %v73_v11 = vld [vmem:[#allocation3 + $0x20] sm:$0xff] }
   0xf   :  { %v136_v9 = vld [vmem:[#allocation6 + $0x18] sm:$0xff]  ;;  %v199_v10 = vsub.f32 %v71_v4, %v135_v5  ;;  %v137_v12 = vld [vmem:[#allocation6 + $0x20] sm:$0xff]  ;;  %v74_v16 = vld [vmem:[#allocation3 + $0x28] sm:$0xff] }
  0x10   :  { %v200_v13 = vsub.f32 %v72_v8, %v136_v9  ;;  %v261_v14 = vmul.f32 %v197_v6, %v197_v6  ;;  %v262_v15 = vmul.f32 %v198_v7, %v198_v7  ;;  %v138_v17 = vld [vmem:[#allocation6 + $0x28] sm:$0xff]  ;;  %v201_v18 = vsub.f32 %v73_v11, %v137_v12  ;;  %v75_v20 = vld [vmem:[#allocation3 + $0x30] sm:$0xff]  ;;  %v76_v25 = vld [vmem:[#allocation3 + $0x38] sm:$0xff] }
  0x11   :  { %v263_v19 = vmul.f32 %v199_v10, %v199_v10  ;;  %v139_v21 = vld [vmem:[#allocation6 + $0x30] sm:$0xff]  ;;  %v202_v22 = vsub.f32 %v74_v16, %v138_v17  ;;  %v140_v26 = vld [vmem:[#allocation6 + $0x38] sm:$0xff]  ;;  %v77_v30 = vld [vmem:[#allocation3 + $0x40] sm:$0xff] }
  0x12   :  { %v264_v23 = vmul.f32 %v200_v13, %v200_v13  ;;  %v326_v24 = vadd.f32 %v262_v15, %v261_v14  ;;  %v203_v27 = vsub.f32 %v75_v20, %v139_v21  ;;  %v265_v28 = vmul.f32 %v201_v18, %v201_v18  ;;  %v141_v31 = vld [vmem:[#allocation6 + $0x40] sm:$0xff]  ;;  %v78_v35 = vld [vmem:[#allocation3 + $0x48] sm:$0xff]  ;;  %v79_v40 = vld [vmem:[#allocation3 + $0x50] sm:$0xff] }
  0x13   :  { %v204_v32 = vsub.f32 %v76_v25, %v140_v26  ;;  %v266_v33 = vmul.f32 %v202_v22, %v202_v22  ;;  %v142_v36 = vld [vmem:[#allocation6 + $0x48] sm:$0xff]  ;;  %v205_v37 = vsub.f32 %v77_v30, %v141_v31  ;;  %v143_v41 = vld [vmem:[#allocation6 + $0x50] sm:$0xff]  ;;  %v80_v45 = vld [vmem:[#allocation3 + $0x58] sm:$0xff] }
  0x14   :  { %v327_v29 = vadd.f32 %v326_v24, %v263_v19  ;;  %v267_v38 = vmul.f32 %v203_v27, %v203_v27  ;;  %v206_v42 = vsub.f32 %v78_v35, %v142_v36  ;;  %v144_v46 = vld [vmem:[#allocation6 + $0x58] sm:$0xff]  ;;  %v207_v47 = vsub.f32 %v79_v40, %v143_v41  ;;  %v81_v50 = vld [vmem:[#allocation3 + $0x60] sm:$0xff]  ;;  %v82_v55 = vld [vmem:[#allocation3 + $0x68] sm:$0xff] }
  0x15   :  { %v268_v43 = vmul.f32 %v204_v32, %v204_v32  ;;  %v269_v48 = vmul.f32 %v205_v37, %v205_v37  ;;  %v145_v51 = vld [vmem:[#allocation6 + $0x60] sm:$0xff]  ;;  %v208_v52 = vsub.f32 %v80_v45, %v144_v46  ;;  %v146_v56 = vld [vmem:[#allocation6 + $0x68] sm:$0xff]  ;;  %v83_v60 = vld [vmem:[#allocation3 + $0x70] sm:$0xff] }
  0x16   :  { %v328_v34 = vadd.f32 %v327_v29, %v264_v23  ;;  %v270_v53 = vmul.f32 %v206_v42, %v206_v42  ;;  %v209_v57 = vsub.f32 %v81_v50, %v145_v51  ;;  %v271_v58 = vmul.f32 %v207_v47, %v207_v47  ;;  %v147_v61 = vld [vmem:[#allocation6 + $0x70] sm:$0xff]  ;;  %v84_v1 = vld [vmem:[#allocation3 + $0x78] sm:$0xff]  ;;  %v85_v6 = vld [vmem:[#allocation3 + $0x80] sm:$0xff] }
  0x17   :  { %v210_v62 = vsub.f32 %v82_v55, %v146_v56  ;;  %v272_v63 = vmul.f32 %v208_v52, %v208_v52  ;;  %v148_v2 = vld [vmem:[#allocation6 + $0x78] sm:$0xff]  ;;  %v211_v3 = vsub.f32 %v83_v60, %v147_v61  ;;  %v149_v7 = vld [vmem:[#allocation6 + $0x80] sm:$0xff]  ;;  %v86_v11 = vld [vmem:[#allocation3 + $0x88] sm:$0xff] }
  0x18   :  { %v329_v39 = vadd.f32 %v328_v34, %v265_v28  ;;  %v273_v4 = vmul.f32 %v209_v57, %v209_v57  ;;  %v212_v8 = vsub.f32 %v84_v1, %v148_v2  ;;  %v150_v12 = vld [vmem:[#allocation6 + $0x88] sm:$0xff]  ;;  %v213_v13 = vsub.f32 %v85_v6, %v149_v7  ;;  %v87_v16 = vld [vmem:[#allocation3 + $0x90] sm:$0xff]  ;;  %v88_v21 = vld [vmem:[#allocation3 + $0x98] sm:$0xff] }
  0x19   :  { %v274_v9 = vmul.f32 %v210_v62, %v210_v62  ;;  %v275_v14 = vmul.f32 %v211_v3, %v211_v3  ;;  %v151_v17 = vld [vmem:[#allocation6 + $0x90] sm:$0xff]  ;;  %v214_v18 = vsub.f32 %v86_v11, %v150_v12  ;;  %v152_v22 = vld [vmem:[#allocation6 + $0x98] sm:$0xff]  ;;  %v89_v26 = vld [vmem:[#allocation3 + $0xa0] sm:$0xff] }
  0x1a   :  { %v330_v44 = vadd.f32 %v329_v39, %v266_v33  ;;  %v276_v19 = vmul.f32 %v212_v8, %v212_v8  ;;  %v215_v23 = vsub.f32 %v87_v16, %v151_v17  ;;  %v277_v24 = vmul.f32 %v213_v13, %v213_v13  ;;  %v153_v27 = vld [vmem:[#allocation6 + $0xa0] sm:$0xff]  ;;  %v90_v31 = vld [vmem:[#allocation3 + $0xa8] sm:$0xff]  ;;  %v91_v36 = vld [vmem:[#allocation3 + $0xb0] sm:$0xff] }
  0x1b   :  { %v216_v28 = vsub.f32 %v88_v21, %v152_v22  ;;  %v278_v29 = vmul.f32 %v214_v18, %v214_v18  ;;  %v154_v32 = vld [vmem:[#allocation6 + $0xa8] sm:$0xff]  ;;  %v217_v33 = vsub.f32 %v89_v26, %v153_v27  ;;  %v155_v37 = vld [vmem:[#allocation6 + $0xb0] sm:$0xff]  ;;  %v92_v41 = vld [vmem:[#allocation3 + $0xb8] sm:$0xff] }
  0x1c   :  { %v331_v49 = vadd.f32 %v330_v44, %v267_v38  ;;  %v279_v34 = vmul.f32 %v215_v23, %v215_v23  ;;  %v218_v38 = vsub.f32 %v90_v31, %v154_v32  ;;  %v156_v42 = vld [vmem:[#allocation6 + $0xb8] sm:$0xff]  ;;  %v93_v46 = vld [vmem:[#allocation3 + $0xc0] sm:$0xff]  ;;  %v94_v51 = vld [vmem:[#allocation3 + $0xc8] sm:$0xff] }
  0x1d   :  { %v280_v39 = vmul.f32 %v216_v28, %v216_v28  ;;  %v281_v44 = vmul.f32 %v217_v33, %v217_v33  ;;  %v157_v47 = vld [vmem:[#allocation6 + $0xc0] sm:$0xff]  ;;  %v158_v52 = vld [vmem:[#allocation6 + $0xc8] sm:$0xff]  ;;  %v95_v56 = vld [vmem:[#allocation3 + $0xd0] sm:$0xff] }
  0x1e   :  { %v332_v54 = vadd.f32 %v331_v49, %v268_v43  ;;  %v219_v43 = vsub.f32 %v91_v36, %v155_v37  ;;  %v282_v49 = vmul.f32 %v218_v38, %v218_v38  ;;  %v159_v57 = vld [vmem:[#allocation6 + $0xd0] sm:$0xff]  ;;  %v96_v61 = vld [vmem:[#allocation3 + $0xd8] sm:$0xff]  ;;  %v97_v2 = vld [vmem:[#allocation3 + $0xe0] sm:$0xff] }
  0x1f   :  { %v160_v62 = vld [vmem:[#allocation6 + $0xd8] sm:$0xff]  ;;  %v161_v3 = vld [vmem:[#allocation6 + $0xe0] sm:$0xff]  ;;  %v98_v7 = vld [vmem:[#allocation3 + $0xe8] sm:$0xff] }
  0x20   :  { %v333_v59 = vadd.f32 %v332_v54, %v269_v48  ;;  %v220_v48 = vsub.f32 %v92_v41, %v156_v42  ;;  %v283_v54 = vmul.f32 %v219_v43, %v219_v43  ;;  %v162_v8 = vld [vmem:[#allocation6 + $0xe8] sm:$0xff]  ;;  %v99_v12 = vld [vmem:[#allocation3 + $0xf0] sm:$0xff]  ;;  %v100_v17 = vld [vmem:[#allocation3 + $0xf8] sm:$0xff] }
  0x21   :  { %v163_v13 = vld [vmem:[#allocation6 + $0xf0] sm:$0xff]  ;;  %v164_v18 = vld [vmem:[#allocation6 + $0xf8] sm:$0xff]  ;;  %v101_v22 = vld [vmem:[#allocation3 + $0x100] sm:$0xff] }
  0x22   :  { %v334_v0 = vadd.f32 %v333_v59, %v270_v53  ;;  %v221_v53 = vsub.f32 %v93_v46, %v157_v47  ;;  %v284_v59 = vmul.f32 %v220_v48, %v220_v48  ;;  %v165_v23 = vld [vmem:[#allocation6 + $0x100] sm:$0xff]  ;;  %v102_v27 = vld [vmem:[#allocation3 + $0x108] sm:$0xff]  ;;  %v103_v32 = vld [vmem:[#allocation3 + $0x110] sm:$0xff] }
  0x23   :  { %v166_v28 = vld [vmem:[#allocation6 + $0x108] sm:$0xff]  ;;  %v167_v33 = vld [vmem:[#allocation6 + $0x110] sm:$0xff]  ;;  %v104_v37 = vld [vmem:[#allocation3 + $0x118] sm:$0xff] }
  0x24   :  { %v335_v5 = vadd.f32 %v334_v0, %v271_v58  ;;  %v222_v58 = vsub.f32 %v94_v51, %v158_v52  ;;  %v285_v0 = vmul.f32 %v221_v53, %v221_v53  ;;  %v168_v38 = vld [vmem:[#allocation6 + $0x118] sm:$0xff]  ;;  %v105_v42 = vld [vmem:[#allocation3 + $0x120] sm:$0xff]  ;;  %v106_v47 = vld [vmem:[#allocation3 + $0x128] sm:$0xff] }
  0x25   :  { %v169_v43 = vld [vmem:[#allocation6 + $0x120] sm:$0xff]  ;;  %v170_v48 = vld [vmem:[#allocation6 + $0x128] sm:$0xff]  ;;  %v107_v52 = vld [vmem:[#allocation3 + $0x130] sm:$0xff] }
  0x26   :  { %v336_v10 = vadd.f32 %v335_v5, %v272_v63  ;;  %v223_v63 = vsub.f32 %v95_v56, %v159_v57  ;;  %v286_v5 = vmul.f32 %v222_v58, %v222_v58  ;;  %v171_v53 = vld [vmem:[#allocation6 + $0x130] sm:$0xff]  ;;  %v108_v57 = vld [vmem:[#allocation3 + $0x138] sm:$0xff] }
  0x27   :  { %v172_v58 = vld [vmem:[#allocation6 + $0x138] sm:$0xff] }
  0x28   :  { %v337_v15 = vadd.f32 %v336_v10, %v273_v4  ;;  %v224_v4 = vsub.f32 %v96_v61, %v160_v62  ;;  %v287_v10 = vmul.f32 %v223_v63, %v223_v63  ;;  %v109_v62 = vld [vmem:[#allocation3 + $0x140] sm:$0xff] }
  0x29   :  { %v173_v63 = vld [vmem:[#allocation6 + $0x140] sm:$0xff] }
  0x2a   :  { %v338_v20 = vadd.f32 %v337_v15, %v274_v9  ;;  %v225_v9 = vsub.f32 %v97_v2, %v161_v3  ;;  %v288_v15 = vmul.f32 %v224_v4, %v224_v4  ;;  %v110_v3 = vld [vmem:[#allocation3 + $0x148] sm:$0xff] }
  0x2b   :  { %v174_v4 = vld [vmem:[#allocation6 + $0x148] sm:$0xff] }
  0x2c   :  { %v339_v25 = vadd.f32 %v338_v20, %v275_v14  ;;  %v226_v14 = vsub.f32 %v98_v7, %v162_v8  ;;  %v289_v20 = vmul.f32 %v225_v9, %v225_v9  ;;  %v111_v8 = vld [vmem:[#allocation3 + $0x150] sm:$0xff] }
  0x2d   :  { %v175_v9 = vld [vmem:[#allocation6 + $0x150] sm:$0xff] }
  0x2e   :  { %v340_v30 = vadd.f32 %v339_v25, %v276_v19  ;;  %v227_v19 = vsub.f32 %v99_v12, %v163_v13  ;;  %v290_v25 = vmul.f32 %v226_v14, %v226_v14  ;;  %v112_v13 = vld [vmem:[#allocation3 + $0x158] sm:$0xff] }
  0x2f   :  { %v176_v14 = vld [vmem:[#allocation6 + $0x158] sm:$0xff] }
  0x30   :  { %v341_v35 = vadd.f32 %v340_v30, %v277_v24  ;;  %v228_v24 = vsub.f32 %v100_v17, %v164_v18  ;;  %v291_v30 = vmul.f32 %v227_v19, %v227_v19  ;;  %v113_v18 = vld [vmem:[#allocation3 + $0x160] sm:$0xff] }
  0x31   :  { %v177_v19 = vld [vmem:[#allocation6 + $0x160] sm:$0xff] }
  0x32   :  { %v342_v40 = vadd.f32 %v341_v35, %v278_v29  ;;  %v229_v29 = vsub.f32 %v101_v22, %v165_v23  ;;  %v292_v35 = vmul.f32 %v228_v24, %v228_v24  ;;  %v114_v23 = vld [vmem:[#allocation3 + $0x168] sm:$0xff] }
  0x33   :  { %v178_v24 = vld [vmem:[#allocation6 + $0x168] sm:$0xff] }
  0x34   :  { %v343_v45 = vadd.f32 %v342_v40, %v279_v34  ;;  %v230_v34 = vsub.f32 %v102_v27, %v166_v28  ;;  %v293_v40 = vmul.f32 %v229_v29, %v229_v29  ;;  %v115_v28 = vld [vmem:[#allocation3 + $0x170] sm:$0xff] }
  0x35   :  { %v179_v29 = vld [vmem:[#allocation6 + $0x170] sm:$0xff] }
  0x36   :  { %v344_v50 = vadd.f32 %v343_v45, %v280_v39  ;;  %v231_v39 = vsub.f32 %v103_v32, %v167_v33  ;;  %v294_v45 = vmul.f32 %v230_v34, %v230_v34  ;;  %v116_v33 = vld [vmem:[#allocation3 + $0x178] sm:$0xff] }
  0x37   :  { %v180_v34 = vld [vmem:[#allocation6 + $0x178] sm:$0xff] }
  0x38   :  { %v345_v55 = vadd.f32 %v344_v50, %v281_v44  ;;  %v232_v44 = vsub.f32 %v104_v37, %v168_v38  ;;  %v295_v50 = vmul.f32 %v231_v39, %v231_v39  ;;  %v117_v38 = vld [vmem:[#allocation3 + $0x180] sm:$0xff] }
  0x39   :  { %v181_v39 = vld [vmem:[#allocation6 + $0x180] sm:$0xff] }
  0x3a   :  { %v346_v60 = vadd.f32 %v345_v55, %v282_v49  ;;  %v233_v49 = vsub.f32 %v105_v42, %v169_v43  ;;  %v296_v55 = vmul.f32 %v232_v44, %v232_v44  ;;  %v118_v43 = vld [vmem:[#allocation3 + $0x188] sm:$0xff] }
  0x3b   :  { %v182_v44 = vld [vmem:[#allocation6 + $0x188] sm:$0xff] }
  0x3c   :  { %v347_v1 = vadd.f32 %v346_v60, %v283_v54  ;;  %v234_v54 = vsub.f32 %v106_v47, %v170_v48  ;;  %v297_v60 = vmul.f32 %v233_v49, %v233_v49  ;;  %v119_v48 = vld [vmem:[#allocation3 + $0x190] sm:$0xff] }
  0x3d   :  { %v183_v49 = vld [vmem:[#allocation6 + $0x190] sm:$0xff] }
  0x3e   :  { %v348_v6 = vadd.f32 %v347_v1, %v284_v59  ;;  %v235_v59 = vsub.f32 %v107_v52, %v171_v53  ;;  %v298_v1 = vmul.f32 %v234_v54, %v234_v54  ;;  %v120_v53 = vld [vmem:[#allocation3 + $0x198] sm:$0xff] }
  0x3f   :  { %v184_v54 = vld [vmem:[#allocation6 + $0x198] sm:$0xff] }
  0x40   :  { %v349_v11 = vadd.f32 %v348_v6, %v285_v0  ;;  %v236_v0 = vsub.f32 %v108_v57, %v172_v58  ;;  %v299_v6 = vmul.f32 %v235_v59, %v235_v59  ;;  %v121_v58 = vld [vmem:[#allocation3 + $0x1a0] sm:$0xff] }
  0x41   :  { %v185_v59 = vld [vmem:[#allocation6 + $0x1a0] sm:$0xff] }
  0x42   :  { %v350_v16 = vadd.f32 %v349_v11, %v286_v5  ;;  %v237_v5 = vsub.f32 %v109_v62, %v173_v63  ;;  %v300_v11 = vmul.f32 %v236_v0, %v236_v0  ;;  %v122_v63 = vld [vmem:[#allocation3 + $0x1a8] sm:$0xff] }
  0x43   :  { %v186_v0 = vld [vmem:[#allocation6 + $0x1a8] sm:$0xff] }
  0x44   :  { %v351_v21 = vadd.f32 %v350_v16, %v287_v10  ;;  %v238_v10 = vsub.f32 %v110_v3, %v174_v4  ;;  %v301_v16 = vmul.f32 %v237_v5, %v237_v5  ;;  %v123_v4 = vld [vmem:[#allocation3 + $0x1b0] sm:$0xff] }
  0x45   :  { %v187_v5 = vld [vmem:[#allocation6 + $0x1b0] sm:$0xff] }
  0x46   :  { %v352_v26 = vadd.f32 %v351_v21, %v288_v15  ;;  %v239_v15 = vsub.f32 %v111_v8, %v175_v9  ;;  %v302_v21 = vmul.f32 %v238_v10, %v238_v10  ;;  %v124_v9 = vld [vmem:[#allocation3 + $0x1b8] sm:$0xff] }
  0x47   :  { %v188_v10 = vld [vmem:[#allocation6 + $0x1b8] sm:$0xff] }
  0x48   :  { %v353_v31 = vadd.f32 %v352_v26, %v289_v20  ;;  %v240_v20 = vsub.f32 %v112_v13, %v176_v14  ;;  %v303_v26 = vmul.f32 %v239_v15, %v239_v15  ;;  %v125_v14 = vld [vmem:[#allocation3 + $0x1c0] sm:$0xff] }
  0x49   :  { %v189_v15 = vld [vmem:[#allocation6 + $0x1c0] sm:$0xff] }
  0x4a   :  { %v354_v36 = vadd.f32 %v353_v31, %v290_v25  ;;  %v241_v25 = vsub.f32 %v113_v18, %v177_v19  ;;  %v304_v31 = vmul.f32 %v240_v20, %v240_v20  ;;  %v126_v19 = vld [vmem:[#allocation3 + $0x1c8] sm:$0xff] }
  0x4b   :  { %v190_v20 = vld [vmem:[#allocation6 + $0x1c8] sm:$0xff] }
  0x4c   :  { %v355_v41 = vadd.f32 %v354_v36, %v291_v30  ;;  %v242_v30 = vsub.f32 %v114_v23, %v178_v24  ;;  %v305_v36 = vmul.f32 %v241_v25, %v241_v25  ;;  %v127_v24 = vld [vmem:[#allocation3 + $0x1d0] sm:$0xff] }
  0x4d   :  { %v191_v25 = vld [vmem:[#allocation6 + $0x1d0] sm:$0xff] }
  0x4e   :  { %v356_v46 = vadd.f32 %v355_v41, %v292_v35  ;;  %v243_v35 = vsub.f32 %v115_v28, %v179_v29  ;;  %v306_v41 = vmul.f32 %v242_v30, %v242_v30  ;;  %v128_v29 = vld [vmem:[#allocation3 + $0x1d8] sm:$0xff] }
  0x4f   :  { %v192_v30 = vld [vmem:[#allocation6 + $0x1d8] sm:$0xff] }
  0x50   :  { %v357_v51 = vadd.f32 %v356_v46, %v293_v40  ;;  %v244_v40 = vsub.f32 %v116_v33, %v180_v34  ;;  %v307_v46 = vmul.f32 %v243_v35, %v243_v35  ;;  %v129_v34 = vld [vmem:[#allocation3 + $0x1e0] sm:$0xff] }
  0x51   :  { %v193_v35 = vld [vmem:[#allocation6 + $0x1e0] sm:$0xff] }
  0x52   :  { %v358_v56 = vadd.f32 %v357_v51, %v294_v45  ;;  %v245_v45 = vsub.f32 %v117_v38, %v181_v39  ;;  %v308_v51 = vmul.f32 %v244_v40, %v244_v40  ;;  %v130_v39 = vld [vmem:[#allocation3 + $0x1e8] sm:$0xff] }
  0x53   :  { %v194_v40 = vld [vmem:[#allocation6 + $0x1e8] sm:$0xff] }
  0x54   :  { %v359_v61 = vadd.f32 %v358_v56, %v295_v50  ;;  %v246_v50 = vsub.f32 %v118_v43, %v182_v44  ;;  %v309_v56 = vmul.f32 %v245_v45, %v245_v45  ;;  %v131_v44 = vld [vmem:[#allocation3 + $0x1f0] sm:$0xff] }
  0x55   :  { %v195_v45 = vld [vmem:[#allocation6 + $0x1f0] sm:$0xff] }
  0x56   :  { %v360_v2 = vadd.f32 %v359_v61, %v296_v55  ;;  %v247_v55 = vsub.f32 %v119_v48, %v183_v49  ;;  %v310_v61 = vmul.f32 %v246_v50, %v246_v50  ;;  %v132_v49 = vld [vmem:[#allocation3 + $0x1f8] sm:$0xff] }
  0x57   :  { %v196_v50 = vld [vmem:[#allocation6 + $0x1f8] sm:$0xff] }
  0x58   :  { %v361_v7 = vadd.f32 %v360_v2, %v297_v60  ;;  %v248_v60 = vsub.f32 %v120_v53, %v184_v54  ;;  %v311_v2 = vmul.f32 %v247_v55, %v247_v55  ;;  %v260_v54 = vsub.f32 %v132_v49, %v196_v50 }
  0x5a   :  { %v362_v12 = vadd.f32 %v361_v7, %v298_v1  ;;  %v249_v1 = vsub.f32 %v121_v58, %v185_v59  ;;  %v312_v7 = vmul.f32 %v248_v60, %v248_v60  ;;  %v324_v59 = vmul.f32 %v260_v54, %v260_v54 }
  0x5c   :  { %v363_v17 = vadd.f32 %v362_v12, %v299_v6  ;;  %v250_v6 = vsub.f32 %v122_v63, %v186_v0  ;;  %v313_v12 = vmul.f32 %v249_v1, %v249_v1 }
  0x5e   :  { %v364_v22 = vadd.f32 %v363_v17, %v300_v11  ;;  %v251_v11 = vsub.f32 %v123_v4, %v187_v5  ;;  %v314_v17 = vmul.f32 %v250_v6, %v250_v6 }
  0x60   :  { %v365_v27 = vadd.f32 %v364_v22, %v301_v16  ;;  %v252_v16 = vsub.f32 %v124_v9, %v188_v10  ;;  %v315_v22 = vmul.f32 %v251_v11, %v251_v11 }
  0x62   :  { %v366_v32 = vadd.f32 %v365_v27, %v302_v21  ;;  %v253_v21 = vsub.f32 %v125_v14, %v189_v15  ;;  %v316_v27 = vmul.f32 %v252_v16, %v252_v16 }
  0x64   :  { %v367_v37 = vadd.f32 %v366_v32, %v303_v26  ;;  %v254_v26 = vsub.f32 %v126_v19, %v190_v20  ;;  %v317_v32 = vmul.f32 %v253_v21, %v253_v21 }
  0x66   :  { %v368_v42 = vadd.f32 %v367_v37, %v304_v31  ;;  %v255_v31 = vsub.f32 %v127_v24, %v191_v25  ;;  %v318_v37 = vmul.f32 %v254_v26, %v254_v26 }
  0x68   :  { %v369_v47 = vadd.f32 %v368_v42, %v305_v36  ;;  %v256_v36 = vsub.f32 %v128_v29, %v192_v30  ;;  %v319_v42 = vmul.f32 %v255_v31, %v255_v31 }
  0x6a   :  { %v370_v52 = vadd.f32 %v369_v47, %v306_v41  ;;  %v257_v41 = vsub.f32 %v129_v34, %v193_v35  ;;  %v320_v47 = vmul.f32 %v256_v36, %v256_v36 }
  0x6c   :  { %v371_v57 = vadd.f32 %v370_v52, %v307_v46  ;;  %v258_v46 = vsub.f32 %v130_v39, %v194_v40  ;;  %v321_v52 = vmul.f32 %v257_v41, %v257_v41 }
  0x6e   :  { %v372_v62 = vadd.f32 %v371_v57, %v308_v51  ;;  %v259_v51 = vsub.f32 %v131_v44, %v195_v45  ;;  %v322_v55 = vmul.f32 %v258_v46, %v258_v46 }
  0x70   :  { %v373_v3 = vadd.f32 %v372_v62, %v309_v56  ;;  %v323_v57 = vmul.f32 %v259_v51, %v259_v51 }
  0x72   :  { %v374_v8 = vadd.f32 %v373_v3, %v310_v61 }
  0x74   :  { %v375_v13 = vadd.f32 %v374_v8, %v311_v2 }
  0x76   :  { %v376_v18 = vadd.f32 %v375_v13, %v312_v7 }
  0x78   :  { %v377_v23 = vadd.f32 %v376_v18, %v313_v12 }
  0x7a   :  { %v378_v28 = vadd.f32 %v377_v23, %v314_v17 }
  0x7c   :  { %v379_v33 = vadd.f32 %v378_v28, %v315_v22 }
  0x7e   :  { %v380_v38 = vadd.f32 %v379_v33, %v316_v27 }
  0x80   :  { %v381_v43 = vadd.f32 %v380_v38, %v317_v32 }
  0x82   :  { %v382_v48 = vadd.f32 %v381_v43, %v318_v37 }
  0x84   :  { %v383_v53 = vadd.f32 %v382_v48, %v319_v42 }
  0x86   :  { %v384_v56 = vadd.f32 %v383_v53, %v320_v47 }
  0x88   :  { %v385_v58 = vadd.f32 %v384_v56, %v321_v52 }
  0x8a   :  { %v386_v60 = vadd.f32 %v385_v58, %v322_v55 }
  0x8c   :  { %v387_v61 = vadd.f32 %v386_v60, %v323_v57 }
  0x8e   :  { %v388_v62 = vadd.f32 %v387_v61, %v324_v59 }
  0x90   :  { %395 = vst [vmem:[#allocation8] sm:$0xff] %v388_v62 }
  0x91   :  { %406 = dma.vmem_to_hbm [thread:$0]  %s402_s1, 128, %s404_s23, [#allocation5]  }
  0x92   :  { %499 = dma.done.wait [#allocation5], 128  }
  0x93   :  { %500 = vsyncadd [#allocation5], 4294967168 }
  0x94   :  { %411 = vsyncpa [#allocation4], 1 }
  0x95   :  { %412 = vsyncpa [#allocation7], 1 }
  0x96   :  { %413 = vsyncpa [#allocation5], 1 }

</bundles_post_ra>
